<compile_context>
chip_gen: v7x
topology: tpu7x:2x2x1
jax: 0.10.0
libtpu: 0.0.40
codegen_flags: <defaults>
</compile_context>

<pallas_src>
import functools

import jax
import jax.numpy as jnp
from jax.experimental import pallas as pl
from jax.experimental.pallas import tpu as pltpu

HIDDEN = 256   # fixed by the module: fc1/fc2/fc3 are 256-wide
LANE = 128     # lane-dense padded output width


def _round_up(x, m):
    return (x + m - 1) // m * m


def actor_kernel(x_ref, w1, b1, w2, b2, w3, b3, w4, b4, out_ref, *, max_action):
    # fc1 -> relu   (bf16 MXU operands, f32 accumulation / elementwise)
    h = jnp.dot(x_ref[...].astype(jnp.bfloat16), w1[...],
                preferred_element_type=jnp.float32) + b1[...]
    h = jnp.maximum(h, 0.0)
    # fc2 -> relu
    h = jnp.dot(h.astype(jnp.bfloat16), w2[...],
                preferred_element_type=jnp.float32) + b2[...]
    h = jnp.maximum(h, 0.0)
    # fc3 -> relu
    h = jnp.dot(h.astype(jnp.bfloat16), w3[...],
                preferred_element_type=jnp.float32) + b3[...]
    h = jnp.maximum(h, 0.0)
    # action_out -> max_action * tanh (output columns zero-padded to LANE lanes)
    a = jnp.dot(h.astype(jnp.bfloat16), w4[...],
                preferred_element_type=jnp.float32) + b4[...]
    out_ref[...] = max_action * jnp.tanh(a)


def init_linear(key, fan_in, fan_out):
    """PyTorch nn.Linear-style uniform init; W returned as [in, out] (bf16)."""
    kw, kb = jax.random.split(key)
    bound = 1.0 / jnp.sqrt(jnp.float32(fan_in))
    w = jax.random.uniform(kw, (fan_in, fan_out), jnp.float32, -bound, bound)
    b = jax.random.uniform(kb, (1, fan_out), jnp.float32, -bound, bound)
    return w.astype(jnp.bfloat16), b          # bf16 MXU operand, f32 bias


def make_params(key, in_dim, act_dim):
    k1, k2, k3, k4 = jax.random.split(key, 4)
    w1, b1 = init_linear(k1, in_dim, HIDDEN)
    w2, b2 = init_linear(k2, HIDDEN, HIDDEN)
    w3, b3 = init_linear(k3, HIDDEN, HIDDEN)
    w4, b4 = init_linear(k4, HIDDEN, act_dim)
    return (w1, b1, w2, b2, w3, b3, w4, b4)


def actor_forward(x, params, *, max_action, tile_b=256):
    w1, b1, w2, b2, w3, b3, w4, b4 = params
    B, in_dim = x.shape
    act_dim = w4.shape[1]

    # Lane-dense output: zero-pad the final layer to LANE output columns.
    w4p = jnp.pad(w4, ((0, 0), (0, LANE - act_dim)))
    b4p = jnp.pad(b4, ((0, 0), (0, LANE - act_dim)))

    # Batch tiling (pad batch to a multiple of the tile; tile multiple of 8).
    tb = min(tile_b, _round_up(B, 8))
    Bp = _round_up(B, tb)
    xp = jnp.pad(x, ((0, Bp - B), (0, 0))) if Bp != B else x

    flat_params = (w1, b1, w2, b2, w3, b3, w4p, b4p)
    # Constant index_map -> weights/biases stay resident in VMEM across steps.
    const_specs = [pl.BlockSpec(p.shape, lambda i: (0, 0)) for p in flat_params]

    flops = int(2 * Bp * (in_dim * HIDDEN + 2 * HIDDEN * HIDDEN + HIDDEN * LANE))
    bytes_accessed = int(xp.size * xp.dtype.itemsize
                         + sum(int(p.size) * p.dtype.itemsize for p in flat_params)
                         + Bp * LANE * 4)

    out = pl.pallas_call(
        functools.partial(actor_kernel, max_action=max_action),
        out_shape=jax.ShapeDtypeStruct((Bp, LANE), jnp.float32),
        grid=(Bp // tb,),
        in_specs=[pl.BlockSpec((tb, in_dim), lambda i: (i, 0))] + const_specs,
        out_specs=pl.BlockSpec((tb, LANE), lambda i: (i, 0)),
        compiler_params=pltpu.CompilerParams(
            dimension_semantics=("parallel",)),
        cost_estimate=pl.CostEstimate(
            flops=flops, transcendentals=int(Bp * LANE),
            bytes_accessed=bytes_accessed),
    )(xp, *flat_params)
    return out[:B, :act_dim]


def actor_ref(x, params, *, max_action):
    """Pure-JAX reference mirroring the PyTorch forward (same bf16/f32 mix)."""
    w1, b1, w2, b2, w3, b3, w4, b4 = params

    def lin(h, w, b):
        return jnp.dot(h.astype(jnp.bfloat16), w,
                       preferred_element_type=jnp.float32) + b

    h = jax.nn.relu(lin(x, w1, b1))
    h = jax.nn.relu(lin(h, w2, b2))
    h = jax.nn.relu(lin(h, w3, b3))
    return max_action * jnp.tanh(lin(h, w4, b4))


if __name__ == "__main__":
    # Small env consistent with the module: obs=10, goal=3, action=4
    env_params = dict(obs=10, goal=3, action=4, action_max=1.0)
    batch = 64
    in_dim = env_params["obs"] + env_params["goal"]

    key = jax.random.PRNGKey(0)
    k_x, k_p = jax.random.split(key)
    x = jax.random.normal(k_x, (batch, in_dim), jnp.float32)
    params = make_params(k_p, in_dim, env_params["action"])

    # tile_b=32 -> grid of 2 so the batch pipeline is actually exercised.
    actions = actor_forward(x, params, max_action=env_params["action_max"],
                            tile_b=32)
    actions = jax.block_until_ready(actions)

    ref = actor_ref(x, params, max_action=env_params["action_max"])
    assert actions.shape == (batch, env_params["action"])
    assert jnp.allclose(actions, ref, atol=1e-3, rtol=1e-3), (
        float(jnp.max(jnp.abs(actions - ref))))
    print("KERNEL_OK")
</pallas_src>

<mosaic_0001>
module attributes {stable_mosaic.version = 11 : i64} {
  func.func @actor_kernel(%arg0: i32, %arg1: memref<32x13xf32, #tpu.memory_space<vmem>>, %arg2: memref<13x256xbf16, #tpu.memory_space<vmem>>, %arg3: memref<1x256xf32, #tpu.memory_space<vmem>>, %arg4: memref<256x256xbf16, #tpu.memory_space<vmem>>, %arg5: memref<1x256xf32, #tpu.memory_space<vmem>>, %arg6: memref<256x256xbf16, #tpu.memory_space<vmem>>, %arg7: memref<1x256xf32, #tpu.memory_space<vmem>>, %arg8: memref<256x128xbf16, #tpu.memory_space<vmem>>, %arg9: memref<1x128xf32, #tpu.memory_space<vmem>>, %arg10: memref<32x128xf32, #tpu.memory_space<vmem>>) attributes {dimension_semantics = [#tpu.dimension_semantics<parallel>], iteration_bounds = array<i64: 2>, scalar_prefetch = 0 : i64, scratch_operands = 0 : i64, tpu.core_type = #tpu.core_type<tc>, window_params = [{transform_indices = @transform_0, window_bounds = array<i64: 32, 13>}, {pipeline_mode = #tpu.pipeline_mode<synchronous>, transform_indices = @transform_1, window_bounds = array<i64: 13, 256>}, {pipeline_mode = #tpu.pipeline_mode<synchronous>, transform_indices = @transform_2, window_bounds = array<i64: 1, 256>}, {pipeline_mode = #tpu.pipeline_mode<synchronous>, transform_indices = @transform_3, window_bounds = array<i64: 256, 256>}, {pipeline_mode = #tpu.pipeline_mode<synchronous>, transform_indices = @transform_4, window_bounds = array<i64: 1, 256>}, {pipeline_mode = #tpu.pipeline_mode<synchronous>, transform_indices = @transform_5, window_bounds = array<i64: 256, 256>}, {pipeline_mode = #tpu.pipeline_mode<synchronous>, transform_indices = @transform_6, window_bounds = array<i64: 1, 256>}, {pipeline_mode = #tpu.pipeline_mode<synchronous>, transform_indices = @transform_7, window_bounds = array<i64: 256, 128>}, {pipeline_mode = #tpu.pipeline_mode<synchronous>, transform_indices = @transform_8, window_bounds = array<i64: 1, 128>}, {transform_indices = @transform_9, window_bounds = array<i64: 32, 128>}]} {
    %c0 = arith.constant 0 : index
    %c0_0 = arith.constant 0 : index
    %0 = vector.load %arg1[%c0, %c0_0] : memref<32x13xf32, #tpu.memory_space<vmem>>, vector<32x13xf32>
    %1 = arith.truncf %0 : vector<32x13xf32> to vector<32x13xbf16>
    %c0_1 = arith.constant 0 : index
    %c0_2 = arith.constant 0 : index
    %2 = vector.load %arg2[%c0_1, %c0_2] : memref<13x256xbf16, #tpu.memory_space<vmem>>, vector<13x256xbf16>
    %cst = arith.constant dense<0.000000e+00> : vector<32x256xf32>
    %3 = tpu.matmul %1, %2, %cst {dimension_numbers = #tpu.dot_dimension_numbers<[1], [0], [0], [1], [0, 0, 1, 1], [], []>} : vector<32x13xbf16>, vector<13x256xbf16>, vector<32x256xf32> -> vector<32x256xf32>
    %c0_3 = arith.constant 0 : index
    %c0_4 = arith.constant 0 : index
    %4 = vector.load %arg3[%c0_3, %c0_4] : memref<1x256xf32, #tpu.memory_space<vmem>>, vector<1x256xf32>
    %5 = vector.broadcast %4 : vector<1x256xf32> to vector<32x256xf32>
    %6 = arith.addf %3, %5 : vector<32x256xf32>
    %cst_5 = arith.constant 0.000000e+00 : f32
    %7 = vector.broadcast %cst_5 : f32 to vector<32x256xf32>
    %8 = arith.maximumf %6, %7 : vector<32x256xf32>
    %9 = arith.truncf %8 : vector<32x256xf32> to vector<32x256xbf16>
    %c0_6 = arith.constant 0 : index
    %c0_7 = arith.constant 0 : index
    %10 = vector.load %arg4[%c0_6, %c0_7] : memref<256x256xbf16, #tpu.memory_space<vmem>>, vector<256x256xbf16>
    %cst_8 = arith.constant dense<0.000000e+00> : vector<32x256xf32>
    %11 = tpu.matmul %9, %10, %cst_8 {dimension_numbers = #tpu.dot_dimension_numbers<[1], [0], [0], [1], [0, 0, 1, 1], [], []>} : vector<32x256xbf16>, vector<256x256xbf16>, vector<32x256xf32> -> vector<32x256xf32>
    %c0_9 = arith.constant 0 : index
    %c0_10 = arith.constant 0 : index
    %12 = vector.load %arg5[%c0_9, %c0_10] : memref<1x256xf32, #tpu.memory_space<vmem>>, vector<1x256xf32>
    %13 = vector.broadcast %12 : vector<1x256xf32> to vector<32x256xf32>
    %14 = arith.addf %11, %13 : vector<32x256xf32>
    %cst_11 = arith.constant 0.000000e+00 : f32
    %15 = vector.broadcast %cst_11 : f32 to vector<32x256xf32>
    %16 = arith.maximumf %14, %15 : vector<32x256xf32>
    %17 = arith.truncf %16 : vector<32x256xf32> to vector<32x256xbf16>
    %c0_12 = arith.constant 0 : index
    %c0_13 = arith.constant 0 : index
    %18 = vector.load %arg6[%c0_12, %c0_13] : memref<256x256xbf16, #tpu.memory_space<vmem>>, vector<256x256xbf16>
    %cst_14 = arith.constant dense<0.000000e+00> : vector<32x256xf32>
    %19 = tpu.matmul %17, %18, %cst_14 {dimension_numbers = #tpu.dot_dimension_numbers<[1], [0], [0], [1], [0, 0, 1, 1], [], []>} : vector<32x256xbf16>, vector<256x256xbf16>, vector<32x256xf32> -> vector<32x256xf32>
    %c0_15 = arith.constant 0 : index
    %c0_16 = arith.constant 0 : index
    %20 = vector.load %arg7[%c0_15, %c0_16] : memref<1x256xf32, #tpu.memory_space<vmem>>, vector<1x256xf32>
    %21 = vector.broadcast %20 : vector<1x256xf32> to vector<32x256xf32>
    %22 = arith.addf %19, %21 : vector<32x256xf32>
    %cst_17 = arith.constant 0.000000e+00 : f32
    %23 = vector.broadcast %cst_17 : f32 to vector<32x256xf32>
    %24 = arith.maximumf %22, %23 : vector<32x256xf32>
    %25 = arith.truncf %24 : vector<32x256xf32> to vector<32x256xbf16>
    %c0_18 = arith.constant 0 : index
    %c0_19 = arith.constant 0 : index
    %26 = vector.load %arg8[%c0_18, %c0_19] : memref<256x128xbf16, #tpu.memory_space<vmem>>, vector<256x128xbf16>
    %cst_20 = arith.constant dense<0.000000e+00> : vector<32x128xf32>
    %27 = tpu.matmul %25, %26, %cst_20 {dimension_numbers = #tpu.dot_dimension_numbers<[1], [0], [0], [1], [0, 0, 1, 1], [], []>} : vector<32x256xbf16>, vector<256x128xbf16>, vector<32x128xf32> -> vector<32x128xf32>
    %c0_21 = arith.constant 0 : index
    %c0_22 = arith.constant 0 : index
    %28 = vector.load %arg9[%c0_21, %c0_22] : memref<1x128xf32, #tpu.memory_space<vmem>>, vector<1x128xf32>
    %29 = vector.broadcast %28 : vector<1x128xf32> to vector<32x128xf32>
    %30 = arith.addf %27, %29 : vector<32x128xf32>
    %31 = math.tanh %30 : vector<32x128xf32>
    %cst_23 = arith.constant 1.000000e+00 : f32
    %32 = vector.broadcast %cst_23 : f32 to vector<32x128xf32>
    %33 = arith.mulf %32, %31 : vector<32x128xf32>
    %c0_24 = arith.constant 0 : index
    %c0_25 = arith.constant 0 : index
    %34 = vector.load %arg10[%c0_24, %c0_25] : memref<32x128xf32, #tpu.memory_space<vmem>>, vector<32x128xf32>
    tpu.vector_store %arg10[%c0_24, %c0_25], %33 {strides = array<i32>} : memref<32x128xf32, #tpu.memory_space<vmem>>, vector<32x128xf32>,
    return
  }
  func.func @transform_0(%arg0: i32) -> (i32, i32) {
    %c0_i32 = arith.constant 0 : i32
    %c0_i32_0 = arith.constant 0 : i32
    return %arg0, %c0_i32 : i32, i32
  }
  func.func @transform_1(%arg0: i32) -> (i32, i32) {
    %c0_i32 = arith.constant 0 : i32
    %c0_i32_0 = arith.constant 0 : i32
    %c0_i32_1 = arith.constant 0 : i32
    return %c0_i32, %c0_i32_0 : i32, i32
  }
  func.func @transform_2(%arg0: i32) -> (i32, i32) {
    %c0_i32 = arith.constant 0 : i32
    %c0_i32_0 = arith.constant 0 : i32
    %c0_i32_1 = arith.constant 0 : i32
    return %c0_i32, %c0_i32_0 : i32, i32
  }
  func.func @transform_3(%arg0: i32) -> (i32, i32) {
    %c0_i32 = arith.constant 0 : i32
    %c0_i32_0 = arith.constant 0 : i32
    %c0_i32_1 = arith.constant 0 : i32
    return %c0_i32, %c0_i32_0 : i32, i32
  }
  func.func @transform_4(%arg0: i32) -> (i32, i32) {
    %c0_i32 = arith.constant 0 : i32
    %c0_i32_0 = arith.constant 0 : i32
    %c0_i32_1 = arith.constant 0 : i32
    return %c0_i32, %c0_i32_0 : i32, i32
  }
  func.func @transform_5(%arg0: i32) -> (i32, i32) {
    %c0_i32 = arith.constant 0 : i32
    %c0_i32_0 = arith.constant 0 : i32
    %c0_i32_1 = arith.constant 0 : i32
    return %c0_i32, %c0_i32_0 : i32, i32
  }
  func.func @transform_6(%arg0: i32) -> (i32, i32) {
    %c0_i32 = arith.constant 0 : i32
    %c0_i32_0 = arith.constant 0 : i32
    %c0_i32_1 = arith.constant 0 : i32
    return %c0_i32, %c0_i32_0 : i32, i32
  }
  func.func @transform_7(%arg0: i32) -> (i32, i32) {
    %c0_i32 = arith.constant 0 : i32
    %c0_i32_0 = arith.constant 0 : i32
    %c0_i32_1 = arith.constant 0 : i32
    return %c0_i32, %c0_i32_0 : i32, i32
  }
  func.func @transform_8(%arg0: i32) -> (i32, i32) {
    %c0_i32 = arith.constant 0 : i32
    %c0_i32_0 = arith.constant 0 : i32
    %c0_i32_1 = arith.constant 0 : i32
    return %c0_i32, %c0_i32_0 : i32, i32
  }
  func.func @transform_9(%arg0: i32) -> (i32, i32) {
    %c0_i32 = arith.constant 0 : i32
    %c0_i32_0 = arith.constant 0 : i32
    return %arg0, %c0_i32 : i32, i32
  }
}

</mosaic_0001>

<bundles_post_ra>
// kernel: tpu_custom_call.1
= control target key start
LH: loop header
LB: loop body
LE: loop exit
PB: predicated region body
PF: predicated region fallthrough
CT: control target
= control target key end

     0   :  { %14 = vsyncpa [#allocation3], 0  ;;  %s2125_s0 = inlined_call_operand.vmem [shape: f32[64,13], index: 0, kind: input, shape index: {}]   ;;  %s2126_s1 = inlined_call_operand.vmem [shape: bf16[13,256], index: 1, kind: input, shape index: {}]   ;;  %s2127_s2 = inlined_call_operand.vmem [shape: f32[1,256], index: 2, kind: input, shape index: {}]   ;;  %s2128_s3 = inlined_call_operand.hbm [shape: bf16[256,256], index: 3, kind: input, shape index: {}]   ;;  %s2129_s4 = inlined_call_operand.vmem [shape: f32[1,256], index: 4, kind: input, shape index: {}]   ;;  %s2130_s5 = inlined_call_operand.hbm [shape: bf16[256,256], index: 5, kind: input, shape index: {}]   ;;  %s2131_s6 = inlined_call_operand.vmem [shape: f32[1,256], index: 6, kind: input, shape index: {}]   ;;  %s2132_s7 = inlined_call_operand.hbm [shape: bf16[256,128], index: 7, kind: input, shape index: {}]   ;;  %s2133_s8 = inlined_call_operand.vmem [shape: f32[1,128], index: 8, kind: input, shape index: {}]   ;;  %s2134_s9 = inlined_call_operand.hbm [shape: f32[64,128], index: 9, kind: output, shape index: {}]  }
   0x1   :  { %15 = vsyncpa [#allocation6], 0 }
   0x2   :  { %16 = vsyncpa [#allocation4], 0 }
   0x3   :  { %18 = vsyncpa [#allocation4 + $0x1], 0  ;;  %s1893_s30 = smov 0   ;;  %s1895_s10 = smov 0  }
   0x4   :  { %s1897_s11 = smov 0   ;;  %s1899_s12 = smov 0  }
   0x5 LB: > { %2143 = sst [smem:[#allocation12_spill]] %s1817_s30  ;;  %s1914_s13 = sadd.s32 4294967295, %s1829_s12   ;;  %s1829_s12 = sphi %s1899_s12, %s2162_s12   ;;  %s1825_s11 = sphi %s1897_s11, %s2164_s11   ;;  %s1821_s10 = sphi %s1895_s10, %s2166_s10   ;;  %s1817_s30 = sphi %s1893_s30, %s2165_s30  }
   0x6   : > { %2144 = sst [smem:[#allocation13_spill]] %s1825_s11  ;;  %s1326_s14 = sadd.s32 4294967294, %s1829_s12  }
   0x7   : > { %s1918_s15 = sadd.s32 1, %s1829_s12   ;;  %s225_s16 = sadd.s32 1, %s1825_s11 }
   0x8   : > { %2145 = sst [smem:[#allocation14_spill]] %s1918_s15  ;;  %s222_s17 = ssub.s32 %s1829_s12, %s1918_s15 }
   0x9   : > { %p235_p0 = scmp.ne.s32.totalorder %s1825_s11, %s1821_s10  ;;  %p223_p1 = scmp.eq.s32.totalorder %s222_s17, 0 }
   0xa   : > { %p236_p2 = scmp.eq.s32.totalorder %s1914_s13, 1  ;;  %p241_p3 = scmp.ne.s32.totalorder %s1821_s10, %s1817_s30 }
   0xb   : > { %p242_p4 = scmp.eq.s32.totalorder %s1326_s14, 1  ;;  %p1327_p7 = scmp.ge.s32.totalorder %s1829_s12, 1 }
   0xc   : > { %s1929_s18 = scalar_select %p223_p1, %s1825_s11, %s225_s16  }
   0xd   : > { %p1931_p5 = por %p236_p2, %p235_p0  ;;  %p1935_p6 = por %p242_p4, %p241_p3 }
   0xe   : > { %2146 = sst [smem:[#allocation15_spill]] %s1929_s18  ;;  %p249_p8 = scmp.lt.s32.totalorder %s1829_s12, 3 }
   0xf   : > { %s2147_s19 = scalar_select %p1931_p5, 1, 0 }
  0x10   : > { %s2148_s20 = scalar_select %p1935_p6, 1, 0 }
  0x11   : > { %p2135_p9 = scmp.eq.s32.totalorder %s1914_s13, 0  ;;  %p1942_p10 = pnand %p1327_p7, %p249_p8 }
  0x12   : > { %2149 = sst [smem:[#allocation16_spill]] %s2148_s20  ;;  %s1831_s22 = smov [#allocation5]  }
  0x13   : > { %s2150_s21 = scalar_select %p1942_p10, 1, 0 }
  0x14   : > { %p1488_p11 = pneg %p1942_p10  ;;  %s283_s23 = sshll.u32 %s1831_s22, 4  ;;  %s1948_s23 = int_to_ptr.vmem [resolvable:$true] %s283_s23 }
  0x15   : > { %s1832_s25 = smov [#allocation2]   ;;  %s1833_s27 = smov [#allocation7]  }
  0x16   : > { %p1952_p12 = pnand %p2135_p9, %p1488_p11  ;;  %s267_s26 = sshll.u32 %s1832_s25, 4  ;;  %s1956_s26 = int_to_ptr.vmem [resolvable:$true] %s267_s26 }
  0x17   : > { %s1958_s28 = sshll.u32 %s1833_s27, 4  ;;  %s1675_s16 = scalar_lea.hbm %s2130_s5, 4096  ;;  %s300_s28 = int_to_ptr.vmem [resolvable:$true] %s1958_s28 }
  0x18   : > { %p1676_p13 = scmp.ne.s32.totalorder %s2130_s5, %s1675_s16  ;;  %p1968_p0 = pneg %p1952_p12 }
  0x19   : > { %p1682_p3 = scmp.lt.u32.totalorder %s1675_s16, %s2130_s5 }
  0x1a   : > { %p1678_p1 = pnand %p1968_p0, %p1676_p13 }
  0x1c   : > { %p1679_p2 = pneg %p1678_p1 }
  0x1e   : > { %p1684_p4 = pnand %p1682_p3, %p1679_p2 }
  0x20   : > { %1687 = shalt.err (!%p1684_p4)
}
  0x21   : > { %s1688_s29 = scalar_lea.vmem %s1948_s23, 4096  ;;  %p1696_p9 = scmp.lt.s32.totalorder %s1948_s23, %s1948_s23 }
  0x22   : > { %p1689_p7 = scmp.ne.s32.totalorder %s1948_s23, %s1688_s29  ;;  %p1697_p6 = scmp.lt.s32.totalorder %s1688_s29, %s1688_s29 }
  0x24   : > { %p1691_p8 = pnand %p1689_p7, %p1968_p0  ;;  %p1698_p13 = por %p1697_p6, %p1696_p9 }
  0x26   : > { %p1692_p11 = pneg %p1691_p8 }
  0x28   : > { %p1699_p1 = pnand %p1698_p13, %p1692_p11 }
  0x2a   : > { %1702 = shalt.err (!%p1699_p1)
}
  0x2b   : > { %s1834_s14 = smov 128   ;;  %s1835_s16 = smov 8  }
  0x2c   : > { %1494 = dma.hbm_to_vmem [thread:$0]  (!%p1952_p12), %s2130_s5, 4096, %s1948_s23, [#allocation6], %s1834_s14, %s1834_s14, %s1835_s16  }
  0x2d   : > { %s1703_s11 = scalar_lea.hbm %s2128_s3, 4096 }
  0x2e   : > { %p1704_p6 = scmp.ne.s32.totalorder %s2128_s3, %s1703_s11  ;;  %p1710_p3 = scmp.lt.u32.totalorder %s1703_s11, %s2128_s3 }
  0x30   : > { %p1706_p9 = pnand %p1704_p6, %p1968_p0 }
  0x32   : > { %p1707_p2 = pneg %p1706_p9 }
  0x34   : > { %p1712_p4 = pnand %p1710_p3, %p1707_p2 }
  0x36   : > { %1715 = shalt.err (!%p1712_p4)
}
  0x37   : > { %s1716_s23 = scalar_lea.vmem %s1956_s26, 4096  ;;  %p1724_p13 = scmp.lt.s32.totalorder %s1956_s26, %s1956_s26 }
  0x38   : > { %p1717_p7 = scmp.ne.s32.totalorder %s1956_s26, %s1716_s23  ;;  %p1725_p1 = scmp.lt.s32.totalorder %s1716_s23, %s1716_s23 }
  0x3a   : > { %p1719_p8 = pnand %p1717_p7, %p1968_p0  ;;  %p1726_p6 = por %p1725_p1, %p1724_p13 }
  0x3c   : > { %p1720_p11 = pneg %p1719_p8 }
  0x3e   : > { %p1727_p9 = pnand %p1726_p6, %p1720_p11 }
  0x40   : > { %1730 = shalt.err (!%p1727_p9)
}
  0x41   : > { %1491 = dma.hbm_to_vmem [thread:$0]  (!%p1952_p12), %s2128_s3, 4096, %s1956_s26, [#allocation3], %s1834_s14, %s1834_s14, %s1835_s16  }
  0x42   : > { %s1731_s17 = scalar_lea.hbm %s2132_s7, 2048 }
  0x43   : > { %p1732_p2 = scmp.ne.s32.totalorder %s2132_s7, %s1731_s17  ;;  %p1738_p7 = scmp.lt.u32.totalorder %s1731_s17, %s2132_s7 }
  0x45   : > { %p1734_p3 = pnand %p1732_p2, %p1968_p0 }
  0x47   : > { %p1735_p4 = pneg %p1734_p3 }
  0x49   : > { %p1740_p8 = pnand %p1738_p7, %p1735_p4 }
  0x4b   : > { %1743 = shalt.err (!%p1740_p8)
}
  0x4c   : > { %s1744_s23 = scalar_lea.vmem %s300_s28, 2048  ;;  %p1752_p6 = scmp.lt.s32.totalorder %s300_s28, %s300_s28 }
  0x4d   : > { %p1745_p11 = scmp.ne.s32.totalorder %s300_s28, %s1744_s23  ;;  %p1753_p9 = scmp.lt.s32.totalorder %s1744_s23, %s1744_s23 }
  0x4f   : > { %p1747_p13 = pnand %p1745_p11, %p1968_p0  ;;  %p1754_p5 = por %p1753_p9, %p1752_p6 }
  0x51   : > { %p1748_p1 = pneg %p1747_p13 }
  0x53   : > { %p1755_p10 = pnand %p1754_p5, %p1748_p1 }
  0x55   : > { %1758 = shalt.err (!%p1755_p10)
}
  0x56   : > { %s1836_s26 = smov 64   ;;  %s1837_s14 = smov 4  }
  0x57   : > { %1497 = dma.hbm_to_vmem [thread:$0]  (!%p1952_p12), %s2132_s7, 2048, %s300_s28, [#allocation6], %s1836_s26, %s1836_s26, %s1837_s14  }
  0x58   : > { %p2153_p2 = scmp.ne.s32.totalorder %s2150_s21, 0 }
  0x59   : > { %p2154_p3 = scmp.eq.s32.totalorder (!%p2153_p2), %s1914_s13, 0 }
  0x5a   : > { %327 = sbr.rel (%p2153_p2) target bundleno = 1031 (0x407), region = 56 }
  0x61   : > { %1804 = dma.done.wait (%p2154_p3), [#allocation3], 4096   ;;  %p2155_p0 = pmov %p2154_p3 }
  0x63   : > { %1806 = vsyncadd (%p2155_p0), [#allocation3], 4294963200  ;;  %p2156_p5 = pmov %p2155_p0 }
  0x64   : > { %p2157_p10 = pmov %p2155_p0 }
  0x65   : > { %1808 = dma.done.wait (%p2156_p5), [#allocation6], 6144  }
  0x66   : > { %1810 = vsyncadd (%p2157_p10), [#allocation6], 4294961152  ;;  %vm414_vm0 = vcmask 1045504   ;;  %v1838_v0 = vmov 0   ;;  %s1337_s18 = sshll.u32 %s1914_s13, 2  ;;  %vm415_vm1 = vcmask 1046528  }
  0x67   : > { %456 = vmatprep.mubr.bf16.mxu0 %v1838_v0  ;;  %p372_p12 = scmp.lt.s32.totalorder %s1337_s18, 7  ;;  %v1839_v1 = vmov 65535   ;;  %v1552_v4 = vld [vmem:[%s2126_s1 + $0x4] ss:$8 sps:$4 sm:$0x7f]   ;;  %vm407_vm2 = vcmask 105472  }
  0x68   : > { %v416_v2 = vsel %vm414_vm0, 4294967295, %v1839_v1  ;;  %v1554_v5 = vld [vmem:[%s2126_s1] ss:$8 sps:$4 sm:$0x7f]   ;;  %v1555_v10 = vld [vmem:[#allocation2 + $0x4] ss:$8 sps:$4 sm:$0xff]  }
  0x69   : > { %s2168_s18 = smov (!%p372_p12, %s1337_s18), 7  ;;  %v417_v3 = vsel %vm415_vm1, %v416_v2, 0  ;;  %v1557_v11 = vld [vmem:[#allocation2] ss:$8 sps:$4 sm:$0xff]   ;;  %v1558_v13 = vld [vmem:[#allocation2 + $0x14] ss:$8 sps:$4 sm:$0xff]   ;;  %693 = vmatprep.subr.bf16.mxu1 %v1555_v10  ;;  %v389_v10 = vlaneseq }
  0x6a   : > { %s1338_s21 = sshll.u32 %s2168_s18, 3  ;;  %v422_v8 = vand.u32 %v1552_v4, %v417_v3  ;;  %v419_v9 = vand.u32 %v1554_v5, %v417_v3  ;;  %694 = vmatpush1.bf16.msra.mxu1 %v1557_v11  ;;  %v1560_v14 = vld [vmem:[#allocation2 + $0x10] ss:$8 sps:$4 sm:$0xff]   ;;  %v1561_v15 = vld [vmem:[#allocation2 + $0x24] ss:$8 sps:$4 sm:$0xff]   ;;  %s368_s18 = sand.u32 1, %s1821_s10  }
  0x6b   : > { %s375_s20 = scalar_lea.vmem %s2125_s0, %s1338_s21  ;;  %695 = vmatprep.subr.bf16.mxu1 %v1558_v13  ;;  %v1563_v18 = vld [vmem:[#allocation2 + $0x20] ss:$8 sps:$4 sm:$0xff]   ;;  %v1564_v19 = vld [vmem:[#allocation2 + $0x34] ss:$8 sps:$4 sm:$0xff]   ;;  %v1566_v21 = vld [vmem:[#allocation2 + $0x30] ss:$8 sps:$4 sm:$0xff]  }
  0x6c   : > { %v379_v6 = vld [vmem:[%s375_s20] sm:$0xff]  ;;  %v380_v7 = vld [vmem:[%s375_s20 + $0x8] sm:$0xff]  ;;  %424 = vmatprep.subr.bf16.mxu0 %v422_v8  ;;  %v381_v16 = vld [vmem:[%s375_s20 + $0x10] sm:$0xff]  ;;  %v390_v11 = vshrl.u32 %v389_v10, 7  ;;  %s1336_s21 = sshll.u32 %s368_s18, 5  ;;  %s1429_s28 = sshll.u32 %s1914_s13, 9 }
  0x6d   : > { %v383_v12 = vpack.c.bf16 %v380_v7, %v379_v6  ;;  %425 = vmatpush1.bf16.msra.mxu0 %v419_v9  ;;  %v382_v17 = vld [vmem:[%s375_s20 + $0x18] sm:$0xff]  ;;  %v1567_v22 = vld [vmem:[#allocation2 + $0x44] ss:$8 sps:$4 sm:$0xff]   ;;  %v1569_v23 = vld [vmem:[#allocation2 + $0x40] ss:$8 sps:$4 sm:$0xff]   ;;  %s370_s24 = scalar_lea.vmem [#allocation8], %s1336_s21  ;;  %s2080_s17 = scalar_lea.hbm %s2134_s9, %s1429_s28 }
  0x6e   : > { %696 = vmatpush1.bf16.msra.mxu1 %v1560_v14  ;;  %v384_v20 = vpack.c.bf16 %v382_v17, %v381_v16  ;;  %v1570_v24 = vld [vmem:[#allocation2 + $0x54] ss:$8 sps:$4 sm:$0xff]   ;;  %v1572_v25 = vld [vmem:[#allocation2 + $0x50] ss:$8 sps:$4 sm:$0xff]   ;;  %v1573_v26 = vld [vmem:[#allocation2 + $0x64] ss:$8 sps:$4 sm:$0xff]  }
  0x6f   : > { %697 = vmatprep.subr.bf16.mxu1 %v1561_v15  ;;  %v1575_v27 = vld [vmem:[#allocation2 + $0x60] ss:$8 sps:$4 sm:$0xff]   ;;  %v1576_v28 = vld [vmem:[#allocation2 + $0x74] ss:$8 sps:$4 sm:$0xff]   ;;  %v1578_v29 = vld [vmem:[#allocation2 + $0x70] ss:$8 sps:$4 sm:$0xff]  }
  0x70   : > { %1341 = vmatmul.mubr.msk.bf16.vlgmr.msra.gmra.mrb[0].mxu0 %vm407_vm2, %v383_v12  ;;  %v1579_v30 = vld [vmem:[#allocation2 + $0x84] ss:$8 sps:$4 sm:$0xff]   ;;  %v1581_v31 = vld [vmem:[#allocation2 + $0x80] ss:$8 sps:$4 sm:$0xff]   ;;  %v1582_v32 = vld [vmem:[#allocation2 + $0x94] ss:$8 sps:$4 sm:$0xff]  }
  0x71   : > { %466 = vmatprep.mubr.bf16.mxu0 %v1838_v0  ;;  %v1584_v33 = vld [vmem:[#allocation2 + $0x90] ss:$8 sps:$4 sm:$0xff]   ;;  %v1585_v34 = vld [vmem:[#allocation2 + $0xa4] ss:$8 sps:$4 sm:$0xff]   ;;  %v1587_v35 = vld [vmem:[#allocation2 + $0xa0] ss:$8 sps:$4 sm:$0xff]  }
  0x72   : > { %698 = vmatpush1.bf16.msra.mxu1 %v1563_v18  ;;  %v1588_v36 = vld [vmem:[#allocation2 + $0xb4] ss:$8 sps:$4 sm:$0xff]   ;;  %v1590_v37 = vld [vmem:[#allocation2 + $0xb0] ss:$8 sps:$4 sm:$0xff]   ;;  %v1591_v38 = vld [vmem:[#allocation2 + $0xc4] ss:$8 sps:$4 sm:$0xff]  }
  0x73   : > { %699 = vmatprep.subr.bf16.mxu1 %v1564_v19  ;;  %v1593_v39 = vld [vmem:[#allocation2 + $0xc0] ss:$8 sps:$4 sm:$0xff]   ;;  %v1594_v40 = vld [vmem:[#allocation2 + $0xd4] ss:$8 sps:$4 sm:$0xff]   ;;  %v1596_v41 = vld [vmem:[#allocation2 + $0xd0] ss:$8 sps:$4 sm:$0xff]  }
  0x74   : > { %v1597_v42 = vld [vmem:[#allocation2 + $0xe4] ss:$8 sps:$4 sm:$0xff]   ;;  %v1599_v43 = vld [vmem:[#allocation2 + $0xe0] ss:$8 sps:$4 sm:$0xff]   ;;  %v1600_v44 = vld [vmem:[#allocation2 + $0xf4] ss:$8 sps:$4 sm:$0xff]  }
  0x75   : > { %v1602_v45 = vld [vmem:[#allocation2 + $0xf0] ss:$8 sps:$4 sm:$0xff]   ;;  %v1603_v46 = vld [vmem:[#allocation5] ss:$8 sps:$4 sm:$0xff]   ;;  %v1605_v47 = vld [vmem:[#allocation5 + $0x4] ss:$8 sps:$4 sm:$0xff]  }
  0x76   : > { %700 = vmatpush1.bf16.msra.mxu1 %v1566_v21  ;;  %v1608_v48 = vld [vmem:[#allocation5 + $0x14] ss:$8 sps:$4 sm:$0xff]   ;;  %962 = vmatprep.subr.bf16.mxu0 %v1605_v47  ;;  %v1606_v49 = vld [vmem:[#allocation5 + $0x10] ss:$8 sps:$4 sm:$0xff]   ;;  %v1611_v50 = vld [vmem:[#allocation5 + $0x24] ss:$8 sps:$4 sm:$0xff]  }
  0x77   : > { %701 = vmatprep.subr.bf16.mxu1 %v1567_v22  ;;  %963 = vmatpush1.bf16.msra.mxu0 %v1603_v46  ;;  %v1609_v51 = vld [vmem:[#allocation5 + $0x20] ss:$8 sps:$4 sm:$0xff]   ;;  %v1614_v52 = vld [vmem:[#allocation5 + $0x34] ss:$8 sps:$4 sm:$0xff]   ;;  %v1612_v53 = vld [vmem:[#allocation5 + $0x30] ss:$8 sps:$4 sm:$0xff]  }
  0x78   : > { %1342 = vmatmul.mubr.msk.bf16.gmra.mrb[4].mxu0 %vm407_vm2, %v384_v20  ;;  %964 = vmatprep.subr.bf16.mxu0 %v1608_v48  ;;  %v1617_v54 = vld [vmem:[#allocation5 + $0x44] ss:$8 sps:$4 sm:$0xff]   ;;  %v1615_v55 = vld [vmem:[#allocation5 + $0x40] ss:$8 sps:$4 sm:$0xff]   ;;  %v1620_v56 = vld [vmem:[#allocation5 + $0x54] ss:$8 sps:$4 sm:$0xff]  }
  0x79   : > { %v1618_v57 = vld [vmem:[#allocation5 + $0x50] ss:$8 sps:$4 sm:$0xff]   ;;  %v1623_v58 = vld [vmem:[#allocation5 + $0x64] ss:$8 sps:$4 sm:$0xff]   ;;  %v1621_v59 = vld [vmem:[#allocation5 + $0x60] ss:$8 sps:$4 sm:$0xff]  }
  0x7a   : > { %702 = vmatpush1.bf16.msra.mxu1 %v1569_v23  ;;  %v1626_v60 = vld [vmem:[#allocation5 + $0x74] ss:$8 sps:$4 sm:$0xff]   ;;  %v1624_v61 = vld [vmem:[#allocation5 + $0x70] ss:$8 sps:$4 sm:$0xff]   ;;  %v1629_v62 = vld [vmem:[#allocation5 + $0x84] ss:$8 sps:$4 sm:$0xff]  }
  0x7b   : > { %703 = vmatprep.subr.bf16.mxu1 %v1570_v24  ;;  %965 = vmatpush1.bf16.msra.mxu0 %v1606_v49  ;;  %v1627_v63 = vld [vmem:[#allocation5 + $0x80] ss:$8 sps:$4 sm:$0xff]   ;;  %v1632_v0 = vld [vmem:[#allocation5 + $0x94] ss:$8 sps:$4 sm:$0xff]   ;;  %v1630_v1 = vld [vmem:[#allocation5 + $0x90] ss:$8 sps:$4 sm:$0xff]  }
  0x7c   : > { %966 = vmatprep.subr.bf16.mxu0 %v1611_v50  ;;  %v1635_v2 = vld [vmem:[#allocation5 + $0xa4] ss:$8 sps:$4 sm:$0xff]   ;;  %v1633_v3 = vld [vmem:[#allocation5 + $0xa0] ss:$8 sps:$4 sm:$0xff]   ;;  %v1638_v4 = vld [vmem:[#allocation5 + $0xb4] ss:$8 sps:$4 sm:$0xff]  }
  0x7d   : > { %v1636_v5 = vld [vmem:[#allocation5 + $0xb0] ss:$8 sps:$4 sm:$0xff]   ;;  %v1641_v6 = vld [vmem:[#allocation5 + $0xc4] ss:$8 sps:$4 sm:$0xff]   ;;  %v1639_v7 = vld [vmem:[#allocation5 + $0xc0] ss:$8 sps:$4 sm:$0xff]  }
  0x7e   : > { %704 = vmatpush1.bf16.msra.mxu1 %v1572_v25  ;;  %v1644_v8 = vld [vmem:[#allocation5 + $0xd4] ss:$8 sps:$4 sm:$0xff]   ;;  %v1642_v9 = vld [vmem:[#allocation5 + $0xd0] ss:$8 sps:$4 sm:$0xff]   ;;  %v2053_v12 = vsub.s32 0, %v390_v11  ;;  %v2058_v14 = vsub.s32 1, %v390_v11 }
  0x7f   : > { %705 = vmatprep.subr.bf16.mxu1 %v1573_v26  ;;  %967 = vmatpush1.bf16.msra.mxu0 %v1609_v51  ;;  %v387_v13 = vld [vmem:[%s2127_s2] sm:$0x3]  ;;  %v1650_v47 = vld [vmem:[#allocation5 + $0xf4] ss:$8 sps:$4 sm:$0xff]   ;;  %v1648_v48 = vld [vmem:[#allocation5 + $0xf0] ss:$8 sps:$4 sm:$0xff]  }
  0x80   : > { %968 = vmatprep.subr.bf16.mxu0 %v1614_v52  ;;  %v392_v15 = vrot.slane %v387_v13, %v2053_v12  ;;  %v396_v16 = vrot.slane %v387_v13, %v2058_v14  ;;  %v1645_v46 = vld [vmem:[#allocation5 + $0xe0] ss:$8 sps:$4 sm:$0xff]   ;;  %s1233_s11 = sshll.u32 %s370_s24, 4  ;;  %s2084_s22 = scalar_lea.sflag [#allocation4], %s368_s18  ;;  %s2082_s11 = int_to_ptr.vmem [resolvable:$true] %s1233_s11 }
  0x81   : > { %v1651_v49 = vld [vmem:[#allocation7 + $0x40] sm:$0xff]   ;;  %v1653_v51 = vld [vmem:[#allocation7 + $0x48] sm:$0xff]   ;;  %s1759_s25 = scalar_lea.vmem %s2082_s11, 512  ;;  %p2158_p7 = scmp.ne.s32.totalorder %s2147_s19, 0 }
  0x82   : > { %706 = vmatpush1.bf16.msra.mxu1 %v1575_v27  ;;  %v1652_v50 = vld [vmem:[#allocation7] sm:$0xff]   ;;  %v1654_v52 = vld [vmem:[#allocation7 + $0x8] sm:$0xff]   ;;  %p1760_p4 = scmp.ne.s32.totalorder %s2082_s11, %s1759_s25  ;;  %s1840_s13 = smov [#allocation8]  }
  0x83   : > { %707 = vmatprep.subr.bf16.mxu1 %v1576_v28  ;;  %969 = vmatpush1.bf16.msra.mxu0 %v1612_v53  ;;  %v1655_v53 = vld [vmem:[#allocation7 + $0x50] sm:$0xff]   ;;  %s1763_s27 = sshll.u32 %s1840_s13, 4  ;;  %s1764_s27 = int_to_ptr.vmem [resolvable:$false] %s1763_s27 }
  0x84   : > { %970 = vmatprep.subr.bf16.mxu0 %v1617_v54  ;;  %v1656_v54 = vld [vmem:[#allocation7 + $0x10] sm:$0xff]   ;;  %p1761_p8 = pnand %p1760_p4, %p2158_p7  ;;  %s1765_s29 = scalar_lea.vmem %s1764_s27, 1024 }
  0x85   : > { %p1766_p13 = scmp.lt.s32.totalorder %s2082_s11, %s1764_s27  ;;  %p1767_p1 = scmp.lt.s32.totalorder %s1765_s29, %s1759_s25 }
  0x86   : > { %708 = vmatpush1.bf16.msra.mxu1 %v1578_v29  ;;  %p1762_p11 = pneg %p1761_p8 }
  0x87   : > { %709 = vmatprep.subr.bf16.mxu1 %v1579_v30  ;;  %971 = vmatpush1.bf16.msra.mxu0 %v1615_v55  ;;  %v1657_v55 = vld [vmem:[#allocation7 + $0x58] sm:$0xff]   ;;  %p1768_p6 = por %p1767_p1, %p1766_p13 }
  0x88   : > { %972 = vmatprep.subr.bf16.mxu0 %v1620_v56  ;;  %v1658_v56 = vld [vmem:[#allocation7 + $0x18] sm:$0xff]  }
  0x89   : > { %p1769_p9 = pnand %p1768_p6, %p1762_p11 }
  0x8a   : > { %710 = vmatpush1.bf16.msra.mxu1 %v1581_v31 }
  0x8b   : > { %711 = vmatprep.subr.bf16.mxu1 %v1582_v32  ;;  %973 = vmatpush1.bf16.msra.mxu0 %v1618_v57  ;;  %v1659_v57 = vld [vmem:[#allocation7 + $0x60] sm:$0xff]  }
  0x8c   : > { %974 = vmatprep.subr.bf16.mxu0 %v1623_v58  ;;  %v1660_v58 = vld [vmem:[#allocation7 + $0x20] sm:$0xff]  }
  0x8e   : > { %712 = vmatpush1.bf16.msra.mxu1 %v1584_v33 }
  0x8f   : > { %713 = vmatprep.subr.bf16.mxu1 %v1585_v34  ;;  %975 = vmatpush1.bf16.msra.mxu0 %v1621_v59  ;;  %v1661_v59 = vld [vmem:[#allocation7 + $0x68] sm:$0xff]  }
  0x90   : > { %976 = vmatprep.subr.bf16.mxu0 %v1626_v60  ;;  %v521_v60 = vld [vmem:[%s2129_s4] sm:$0x3] }
  0x92   : > { %714 = vmatpush1.bf16.msra.mxu1 %v1587_v35 }
  0x93   : > { %715 = vmatprep.subr.bf16.mxu1 %v1588_v36  ;;  %977 = vmatpush1.bf16.msra.mxu0 %v1624_v61  ;;  %v526_v61 = vrot.slane %v521_v60, %v2053_v12 }
  0x94   : > { %978 = vmatprep.subr.bf16.mxu0 %v1629_v62  ;;  %v530_v62 = vrot.slane %v521_v60, %v2058_v14 }
  0x96   : > { %716 = vmatpush1.bf16.msra.mxu1 %v1590_v37 }
  0x97   : > { %717 = vmatprep.subr.bf16.mxu1 %v1591_v38  ;;  %979 = vmatpush1.bf16.msra.mxu0 %v1627_v63 }
  0x98   : > { %980 = vmatprep.subr.bf16.mxu0 %v1632_v0 }
  0x9a   : > { %718 = vmatpush1.bf16.msra.mxu1 %v1593_v39 }
  0x9b   : > { %719 = vmatprep.subr.bf16.mxu1 %v1594_v40  ;;  %981 = vmatpush1.bf16.msra.mxu0 %v1630_v1 }
  0x9c   : > { %982 = vmatprep.subr.bf16.mxu0 %v1635_v2 }
  0x9e   : > { %720 = vmatpush1.bf16.msra.mxu1 %v1596_v41 }
  0x9f   : > { %721 = vmatprep.subr.bf16.mxu1 %v1597_v42  ;;  %983 = vmatpush1.bf16.msra.mxu0 %v1633_v3 }
  0xa0   : > { %984 = vmatprep.subr.bf16.mxu0 %v1638_v4 }
  0xa2   : > { %722 = vmatpush1.bf16.msra.mxu1 %v1599_v43 }
  0xa3   : > { %723 = vmatprep.subr.bf16.mxu1 %v1600_v44  ;;  %985 = vmatpush1.bf16.msra.mxu0 %v1636_v5 }
  0xa4   : > { %986 = vmatprep.subr.bf16.mxu0 %v1641_v6 }
  0xa6   : > { %724 = vmatpush1.bf16.msra.mxu1 %v1602_v45  ;;  %v1647_v45 = vld [vmem:[#allocation5 + $0xe4] ss:$8 sps:$4 sm:$0xff]  }
  0xa7   : > { %987 = vmatpush1.bf16.msra.mxu0 %v1639_v7  ;;  %1458 = vmatprep.subr.bf16.mxu1 %v1651_v49 }
  0xa8   : > { %988 = vmatprep.subr.bf16.mxu0 %v1644_v8 }
  0xab   : > { %989 = vmatpush1.bf16.msra.mxu0 %v1642_v9 }
  0xac   : > { %990 = vmatprep.subr.bf16.mxu0 %v1647_v45 }
  0xaf   : > { %991 = vmatpush1.bf16.msra.mxu0 %v1645_v46 }
  0xb0   : > { %992 = vmatprep.subr.bf16.mxu0 %v1650_v47 }
  0xb3   : > { %993 = vmatpush1.bf16.msra.mxu0 %v1648_v48 }
  0xb4   : > { %1430 = vmatprep.subr.bf16.mxu0 %v1651_v49 }
 0x143   : > { %v458_v17 = vpop.f32.mrb[0].mxu0 }
 0x144   : > { %v459_v18 = vadd.f32 %v458_v17, %v392_v15  ;;  %v460_v19 = vpop.f32.mrb[1].mxu0 }
 0x145   : > { %v461_v20 = vadd.f32 %v460_v19, %v396_v16  ;;  %v462_v21 = vpop.f32.mrb[2].mxu0 }
 0x146   : > { %v463_v22 = vadd.f32 %v462_v21, %v392_v15  ;;  %v464_v23 = vpop.f32.mrb[3].mxu0  ;;  %v477_v25 = vmax.f32 %v459_v18, 0.0 }
 0x147   : > { %v465_v24 = vadd.f32 %v464_v23, %v396_v16  ;;  %v478_v27 = vmax.f32 %v461_v20, 0.0 }
 0x148   : > { %v479_v26 = vmax.f32 %v463_v22, 0.0 }
 0x149   : > { %v480_v28 = vmax.f32 %v465_v24, 0.0 }
 0x14a   : > { %v485_v29 = vpack.c.bf16 %v479_v26, %v477_v25 }
 0x14b   : > { %v468_v30 = vpop.f32.mrb[4].mxu0  ;;  %v486_v31 = vpack.c.bf16 %v480_v28, %v478_v27 }
 0x14c   : > { %v469_v32 = vadd.f32 %v468_v30, %v392_v15  ;;  %v470_v33 = vpop.f32.mrb[5].mxu0  ;;  %v1663_v30 = vld [vmem:[#allocation7 + $0x70] sm:$0xff]  }
 0x14d   : > { %v471_v34 = vadd.f32 %v470_v33, %v396_v16  ;;  %v472_v35 = vpop.f32.mrb[6].mxu0  ;;  %725 = vmatprep.mubr.bf16.mxu1 %v486_v31  ;;  %v1664_v31 = vld [vmem:[#allocation7 + $0x30] sm:$0xff]   ;;  %v1666_v33 = vld [vmem:[#allocation7 + $0x38] sm:$0xff]  }
 0x14e   : > { %v473_v36 = vadd.f32 %v472_v35, %v392_v15  ;;  %v474_v37 = vpop.f32.mrb[7].mxu0  ;;  %726 = vmatmul.mubr.bf16.vlgmr.msra.gmra.mrb[0].mxu1 %v485_v29  ;;  %v481_v39 = vmax.f32 %v469_v32, 0.0  ;;  %v1662_v29 = vld [vmem:[#allocation7 + $0x28] sm:$0xff]   ;;  %v1665_v32 = vld [vmem:[#allocation7 + $0x78] sm:$0xff]  }
 0x14f   : > { %v475_v38 = vadd.f32 %v474_v37, %v396_v16  ;;  %v482_v41 = vmax.f32 %v471_v34, 0.0  ;;  %1466 = vmatpush3.bf16.msra.mxu1 %v1652_v50  ;;  %v790_v34 = vld [vmem:[%s2131_s6] sm:$0x3] }
 0x150   : > { %v483_v40 = vmax.f32 %v473_v36, 0.0  ;;  %1459 = vmatprep.subr.bf16.mxu1 %v1653_v51  ;;  %v795_v35 = vrot.slane %v790_v34, %v2053_v12  ;;  %v799_v36 = vrot.slane %v790_v34, %v2058_v14 }
 0x151   : > { %v484_v42 = vmax.f32 %v475_v38, 0.0 }
 0x152   : > { %v487_v43 = vpack.c.bf16 %v483_v40, %v481_v39 }
 0x153   : > { %v488_v44 = vpack.c.bf16 %v484_v42, %v482_v41  ;;  %1467 = vmatpush3.bf16.msra.mxu1 %v1654_v52 }
 0x154   : > { %1460 = vmatprep.subr.bf16.mxu1 %v1655_v53 }
 0x155   : > { %735 = vmatprep.mubr.bf16.mxu1 %v488_v44 }
 0x156   : > { %736 = vmatmul.mubr.bf16.gmra.mrb[4].mxu1 %v487_v43 }
 0x157   : > { %1468 = vmatpush3.bf16.msra.mxu1 %v1656_v54 }
 0x158   : > { %1461 = vmatprep.subr.bf16.mxu1 %v1657_v55 }
 0x15b   : > { %1469 = vmatpush3.bf16.msra.mxu1 %v1658_v56 }
 0x15c   : > { %1462 = vmatprep.subr.bf16.mxu1 %v1659_v57 }
 0x15f   : > { %1470 = vmatpush3.bf16.msra.mxu1 %v1660_v58 }
 0x160   : > { %1463 = vmatprep.subr.bf16.mxu1 %v1661_v59 }
 0x163   : > { %1471 = vmatpush3.bf16.msra.mxu1 %v1662_v29 }
 0x164   : > { %1464 = vmatprep.subr.bf16.mxu1 %v1663_v30 }
 0x167   : > { %1472 = vmatpush3.bf16.msra.mxu1 %v1664_v31 }
 0x168   : > { %1465 = vmatprep.subr.bf16.mxu1 %v1665_v32 }
 0x16b   : > { %1473 = vmatpush3.bf16.msra.mxu1 %v1666_v33 }
 0x221   : > { %v727_v63 = vpop.f32.mrb[0].mxu1 }
 0x222   : > { %v728_v0 = vadd.f32 %v727_v63, %v526_v61  ;;  %v729_v1 = vpop.f32.mrb[1].mxu1 }
 0x223   : > { %v730_v2 = vadd.f32 %v729_v1, %v530_v62  ;;  %v731_v3 = vpop.f32.mrb[2].mxu1 }
 0x224   : > { %v732_v4 = vadd.f32 %v731_v3, %v526_v61  ;;  %v733_v5 = vpop.f32.mrb[3].mxu1  ;;  %v746_v7 = vmax.f32 %v728_v0, 0.0  ;;  %v1407_v0 = vld [vmem:[%s2133_s8] ss:$0 sm:$0xff] }
 0x225   : > { %v734_v6 = vadd.f32 %v733_v5, %v530_v62  ;;  %v747_v9 = vmax.f32 %v730_v2, 0.0 }
 0x226   : > { %v748_v8 = vmax.f32 %v732_v4, 0.0 }
 0x227   : > { %v749_v10 = vmax.f32 %v734_v6, 0.0 }
 0x228   : > { %v754_v11 = vpack.c.bf16 %v748_v8, %v746_v7 }
 0x229   : > { %v755_v13 = vpack.c.bf16 %v749_v10, %v747_v9  ;;  %v737_v15 = vpop.f32.mrb[4].mxu1 }
 0x22a   : > { %v738_v16 = vadd.f32 %v737_v15, %v526_v61  ;;  %v739_v17 = vpop.f32.mrb[5].mxu1 }
 0x22b   : > { %v740_v18 = vadd.f32 %v739_v17, %v530_v62  ;;  %v741_v19 = vpop.f32.mrb[6].mxu1  ;;  %994 = vmatprep.mubr.bf16.mxu0 %v755_v13 }
 0x22c   : > { %v742_v20 = vadd.f32 %v741_v19, %v526_v61  ;;  %v743_v21 = vpop.f32.mrb[7].mxu1  ;;  %995 = vmatmul.mubr.bf16.vlgmr.msra.gmra.mrb[8].mxu0 %v754_v11  ;;  %v750_v23 = vmax.f32 %v738_v16, 0.0 }
 0x22d   : > { %v744_v22 = vadd.f32 %v743_v21, %v530_v62  ;;  %1431 = vmatpush3.bf16.msra.mxu0 %v1652_v50  ;;  %v751_v25 = vmax.f32 %v740_v18, 0.0 }
 0x22e   : > { %v752_v24 = vmax.f32 %v742_v20, 0.0  ;;  %1432 = vmatprep.subr.bf16.mxu0 %v1653_v51 }
 0x22f   : > { %v753_v26 = vmax.f32 %v744_v22, 0.0 }
 0x230   : > { %v756_v27 = vpack.c.bf16 %v752_v24, %v750_v23 }
 0x231   : > { %v757_v28 = vpack.c.bf16 %v753_v26, %v751_v25  ;;  %1433 = vmatpush3.bf16.msra.mxu0 %v1654_v52 }
 0x232   : > { %1434 = vmatprep.subr.bf16.mxu0 %v1655_v53 }
 0x233   : > { %1004 = vmatprep.mubr.bf16.mxu0 %v757_v28 }
 0x234   : > { %1005 = vmatmul.mubr.bf16.gmra.mrb[12].mxu0 %v756_v27 }
 0x235   : > { %1435 = vmatpush3.bf16.msra.mxu0 %v1656_v54 }
 0x236   : > { %1436 = vmatprep.subr.bf16.mxu0 %v1657_v55 }
 0x239   : > { %1437 = vmatpush3.bf16.msra.mxu0 %v1658_v56 }
 0x23a   : > { %1438 = vmatprep.subr.bf16.mxu0 %v1659_v57 }
 0x23d   : > { %1439 = vmatpush3.bf16.msra.mxu0 %v1660_v58 }
 0x23e   : > { %1440 = vmatprep.subr.bf16.mxu0 %v1661_v59 }
 0x241   : > { %1441 = vmatpush3.bf16.msra.mxu0 %v1662_v29 }
 0x242   : > { %1442 = vmatprep.subr.bf16.mxu0 %v1663_v30 }
 0x245   : > { %1443 = vmatpush3.bf16.msra.mxu0 %v1664_v31 }
 0x246   : > { %1444 = vmatprep.subr.bf16.mxu0 %v1665_v32 }
 0x249   : > { %1445 = vmatpush3.bf16.msra.mxu0 %v1666_v33 }
 0x2ff   : > { %v996_v37 = vpop.f32.mrb[8].mxu0 }
 0x300   : > { %v997_v38 = vadd.f32 %v996_v37, %v795_v35  ;;  %v998_v39 = vpop.f32.mrb[9].mxu0 }
 0x301   : > { %v999_v40 = vadd.f32 %v998_v39, %v799_v36  ;;  %v1000_v41 = vpop.f32.mrb[10].mxu0 }
 0x302   : > { %v1001_v42 = vadd.f32 %v1000_v41, %v795_v35  ;;  %v1002_v43 = vpop.f32.mrb[11].mxu0  ;;  %v1015_v45 = vmax.f32 %v997_v38, 0.0 }
 0x303   : > { %v1003_v44 = vadd.f32 %v1002_v43, %v799_v36  ;;  %v1016_v47 = vmax.f32 %v999_v40, 0.0 }
 0x304   : > { %v1017_v46 = vmax.f32 %v1001_v42, 0.0 }
 0x305   : > { %v1018_v48 = vmax.f32 %v1003_v44, 0.0 }
 0x306   : > { %v1023_v49 = vpack.c.bf16 %v1017_v46, %v1015_v45 }
 0x307   : > { %v1024_v50 = vpack.c.bf16 %v1018_v48, %v1016_v47  ;;  %v1006_v51 = vpop.f32.mrb[12].mxu0 }
 0x308   : > { %v1007_v52 = vadd.f32 %v1006_v51, %v795_v35  ;;  %v1008_v53 = vpop.f32.mrb[13].mxu0 }
 0x309   : > { %v1009_v12 = vadd.f32 %v1008_v53, %v799_v36  ;;  %v1010_v54 = vpop.f32.mrb[14].mxu0  ;;  %1194 = vmatprep.mubr.bf16.mxu0 %v1024_v50 }
 0x30a   : > { %v1011_v14 = vadd.f32 %v1010_v54, %v795_v35  ;;  %v1012_v55 = vpop.f32.mrb[15].mxu0  ;;  %1195 = vmatmul.mubr.bf16.vlgmr.msra.gmra.mrb[16].mxu0 %v1023_v49  ;;  %v1019_v57 = vmax.f32 %v1007_v52, 0.0 }
 0x30b   : > { %v1013_v56 = vadd.f32 %v1012_v55, %v799_v36  ;;  %v1020_v59 = vmax.f32 %v1009_v12, 0.0 }
 0x30c   : > { %v1021_v58 = vmax.f32 %v1011_v14, 0.0 }
 0x30d   : > { %v1022_v60 = vmax.f32 %v1013_v56, 0.0 }
 0x30e   : > { %v1025_v61 = vpack.c.bf16 %v1021_v58, %v1019_v57 }
 0x30f   : > { %v1026_v62 = vpack.c.bf16 %v1022_v60, %v1020_v59 }
 0x311   : > { %1202 = vmatprep.mubr.bf16.mxu1 %v1026_v62 }
 0x312   : > { %1203 = vmatmul.mubr.bf16.vlgmr.msra.gmra.mrb[8].mxu1 %v1025_v61 }
 0x3dd   : > { %v1446_v63 = vpop.f32.mrb[16].mxu0 }
 0x3de   : > { %v1447_v1 = vpop.f32.mrb[17].mxu0 }
 0x3df   : > { %v1448_v2 = vadd.f32 %v1447_v1, %v1446_v63  ;;  %v1449_v3 = vpop.f32.mrb[18].mxu0 }
 0x3e0   : > { %v1450_v4 = vpop.f32.mrb[19].mxu0 }
 0x3e1   : > { %v1197_v5 = vadd.f32 %v1448_v2, %v1407_v0  ;;  %v1451_v6 = vadd.f32 %v1450_v4, %v1449_v3 }
 0x3e3   : > { %1667 = vtanh.f32 %v1197_v5  ;;  %v1200_v7 = vadd.f32 %v1451_v6, %v1407_v0 }
 0x3e5   : > { %1669 = vtanh.f32 %v1200_v7  ;;  %v1452_v8 = vpop.f32.mrb[8].mxu1 }
 0x3e6   : > { %v1453_v9 = vpop.f32.mrb[9].mxu1 }
 0x3e7   : > { %v1454_v10 = vadd.f32 %v1453_v9, %v1452_v8  ;;  %v1455_v11 = vpop.f32.mrb[10].mxu1 }
 0x3e8   : > { %v1456_v13 = vpop.f32.mrb[11].mxu1 }
 0x3e9   : > { %v1205_v15 = vadd.f32 %v1454_v10, %v1407_v0  ;;  %v1457_v16 = vadd.f32 %v1456_v13, %v1455_v11 }
 0x3eb   : > { %1671 = vtanh.f32 %v1205_v15  ;;  %v1208_v17 = vadd.f32 %v1457_v16, %v1407_v0 }
 0x3ed   : > { %v1668_v18 = vpop.eup %1667  ;;  %1673 = vtanh.f32 %v1208_v17 }
 0x3ee   : > { %1215 = vst [vmem:[%s370_s24] sm:$0xff] %v1668_v18 }
 0x3ef   : > { %v1670_v19 = vpop.eup %1669 }
 0x3f0   : > { %1216 = vst [vmem:[%s370_s24 + $0x8] sm:$0xff] %v1670_v19 }
 0x3f5   : > { %v1672_v20 = vpop.eup %1671 }
 0x3f6   : > { %1217 = vst [vmem:[%s370_s24 + $0x10] sm:$0xff] %v1672_v20 }
 0x3f7   : > { %v1674_v21 = vpop.eup %1673 }
 0x3f8   : > { %1218 = vst [vmem:[%s370_s24 + $0x18] sm:$0xff] %v1674_v21 }
 0x3f9   : > { %1772 = shalt.err (!%p1769_p9)
}
 0x3fa   : > { %s1773_s23 = scalar_lea.hbm %s2080_s17, 512  ;;  %s1777_s16 = scalar_lea.hbm %s2134_s9, 1024 }
 0x3fb   : > { %p1774_p2 = scmp.ne.s32.totalorder %s2080_s17, %s1773_s23  ;;  %p1778_p5 = scmp.lt.u32.totalorder %s2080_s17, %s2134_s9 }
 0x3fc   : > { %p1779_p10 = scmp.lt.u32.totalorder %s1777_s16, %s1773_s23  ;;  %p1781_p4 = scmp.lt.u32.totalorder %s1773_s23, %s2080_s17 }
 0x3fd   : > { %p1775_p3 = pnand %p1774_p2, %p2158_p7 }
 0x3fe   : > { %p1780_p12 = por %p1779_p10, %p1778_p5 }
 0x3ff   : > { %p1776_p0 = pneg %p1775_p3 }
 0x400   : > { %p1782_p8 = por %p1781_p4, %p1780_p12 }
 0x402   : > { %p1783_p11 = pnand %p1782_p8, %p1776_p0 }
 0x404   : > { %1786 = shalt.err (!%p1783_p11)
}
 0x405   : > { %s1841_s21 = smov 128   ;;  %s1842_s24 = smov 8  }
 0x406   : > { %1486 = dma.vmem_to_hbm [thread:$0]  (%p2158_p7), %s2082_s11, 512, %s2080_s17, %s2084_s22, %s1841_s21, %s1841_s21, %s1842_s24  }
 0x407 PF: > { %s2159_s28 = sld [smem:[#allocation12_spill]]  ;;  %s2160_s15 = sld [smem:[#allocation16_spill]] }
 0x408   : > { %p1508_p13 = scmp.ge.s32.totalorder %s1829_s12, 2 }
 0x40d   : > { %s1248_s20 = sand.u32 1, %s2159_s28   ;;  %p2161_p1 = scmp.ne.s32.totalorder %s2160_s15, 0 }
 0x40e   : > { %s1249_s25 = scalar_lea.sflag [#allocation4], %s1248_s20 }
 0x40f   : > { %p1499_p6 = pnand %p1508_p13, %p2161_p1 }
 0x411   : > { %1812 = dma.done.wait (!%p1499_p6), %s1249_s25, 512  }
 0x412   : > { %1814 = vsyncadd (!%p1499_p6), %s1249_s25, 4294966784  ;;  %s2162_s12 = sld [smem:[#allocation14_spill]]  ;;  %s2163_s13 = sld [smem:[#allocation13_spill]] }
 0x413   : > { %s2164_s11 = sld [smem:[#allocation15_spill]]  ;;  %s2165_s30 = smov %s1821_s10 }
 0x418   : > { %p21_p9 = scmp.ge.s32.totalorder %s2162_s12, 4   ;;  %s2166_s10 = smov %s2163_s13 }
 0x41a   :  { %23 = sbr.rel (!%p21_p9) target bundleno = 5 (0x5), region = 104 }
 0x421   :  { %1254 = vsyncpa [#allocation3], 1 }
 0x422   :  { %1256 = vsyncpa [#allocation3 + $0x1], 1 }
 0x423   :  { %1257 = vsyncpa [#allocation6], 1 }
 0x424   :  { %1258 = vsyncpa [#allocation4], 1 }
 0x425   :  { %1260 = vsyncpa [#allocation4 + $0x1], 1 }

</bundles_post_ra>
